<compile_context>
chip_gen: v6e
topology: v6e:2x2x1
jax: 0.10.0
libtpu: 0.0.40
codegen_flags: <defaults>
</compile_context>

<pallas_src>
import functools

import jax
import jax.numpy as jnp
from jax.experimental import pallas as pl
from jax.experimental.pallas import tpu as pltpu

_TM_MAX = 2048  # multiple of 256; keeps double-buffered tiles inside v5e's
                # 16 MiB scoped-VMEM default (see accounting in header).


def _postnet_kernel(x_ref, w_ref, b_ref, o_ref):
    # x_ref: (TM, K) tile, w_ref: (K, N) resident, b_ref: (1, N) resident,
    # o_ref: (TM, N) tile.  f32 accumulation on the MXU regardless of I/O dtype.
    acc = jnp.dot(x_ref[...], w_ref[...], preferred_element_type=jnp.float32)
    acc = acc + b_ref[...]          # broadcast bias over rows (f32)
    o_ref[...] = acc.astype(o_ref.dtype)


def prepare_postnet_params(weight, bias):
    """One-time parameter prep (outside the hot path).

    weight: (out_features, in_features) PyTorch layout -> (K, N)
    bias:   (out_features,)                            -> (1, N)
    """
    return weight.T, bias.reshape(1, -1)


def _round_up(x, m):
    return ((x + m - 1) // m) * m


def _pick_tm(m, tm_max=_TM_MAX):
    """Pick the M-tile size.

    * m <= tm_max: a single full-M tile (legal block shape even if m % 8 != 0,
      since the block equals the full array dim).
    * m  > tm_max: an even, balanced number of tiles so a v7x megacore split of
      the row-tile axis gives both TensorCores equal work; TM is a multiple of
      256 (MXU/sublane friendly) capped at tm_max.
    """
    if m <= tm_max:
        return m
    k = pl.cdiv(m, 2 * tm_max)            # number of tile *pairs*
    tm = pl.cdiv(m, 2 * k)                # balanced tile size
    tm = min(_round_up(tm, 256), tm_max)  # multiple of 256, capped
    return tm


@functools.partial(
    jax.jit,
    static_argnames=("out_len", "output_size", "compute_dtype", "out_dtype"))
def postnet_forward(inputs, w_kn, b_2d, out_len, output_size,
                    compute_dtype=None, out_dtype=None):
    """Pallas forward.

    inputs: (..., input_size)
    w_kn:   (input_size, out_len*output_size)  -- already transposed
    b_2d:   (1, out_len*output_size)

    compute_dtype: optional (e.g. jnp.bfloat16) dtype for the x/W reads.  Only
        trims ~K/(K+N) (~9% here) of HBM traffic since the output write
        dominates; MXU accumulation stays f32.  Worth enabling on v5e too
        (bf16-native MXU, negligible cast cost) when numerics allow.
    out_dtype: optional output dtype.  Defaults to compute_dtype if set, else
        inputs.dtype.  bf16 output is the big lever on this write-bound kernel
        (~1.8x fewer total HBM bytes) but deviates from PyTorch f32 numerics,
        so it is an explicit opt-in.

    Returns (-1, out_len, output_size).
    """
    in_features = inputs.shape[-1]
    out_features = w_kn.shape[-1]
    assert out_features == out_len * output_size

    x2d = inputs.reshape(-1, in_features)        # (M, K)
    M, K = x2d.shape
    N = out_features

    if out_dtype is None:
        out_dtype = compute_dtype if compute_dtype is not None else inputs.dtype

    if compute_dtype is not None:
        x2d = x2d.astype(compute_dtype)
        w_kn = w_kn.astype(compute_dtype)

    TM = _pick_tm(M)
    grid = (pl.cdiv(M, TM),)

    in_itemsize = jnp.dtype(x2d.dtype).itemsize
    out_itemsize = jnp.dtype(out_dtype).itemsize
    cost = pl.CostEstimate(
        flops=2 * M * K * N,
        transcendentals=0,
        bytes_accessed=(in_itemsize * (M * K + K * N) + 4 * N
                        + out_itemsize * M * N),
    )

    out2d = pl.pallas_call(
        _postnet_kernel,
        out_shape=jax.ShapeDtypeStruct((M, N), out_dtype),
        grid_spec=pltpu.PrefetchScalarGridSpec(
            num_scalar_prefetch=0,
            grid=grid,
            in_specs=[
                pl.BlockSpec((TM, K), lambda i: (i, 0)),   # x tile marches over M
                pl.BlockSpec((K, N), lambda i: (0, 0)),    # weight resident in VMEM
                pl.BlockSpec((1, N), lambda i: (0, 0)),    # bias resident in VMEM
            ],
            # Full-N (320) output block: lane-dense stores, do NOT pad N to 384
            # (that would add +20% bytes on a write-bound kernel) nor tile N
            # (would re-read W and break lane density).
            out_specs=pl.BlockSpec((TM, N), lambda i: (i, 0)),
        ),
        # TODO(synk): verify in xprof that "parallel" actually shards the
        # row-tile axis across both v7x TensorCores; if one TC idles, switch
        # this axis to pltpu.CORE_PARALLEL (or pl.core_map with an explicit
        # 2-wide split).
        compiler_params=pltpu.CompilerParams(
            dimension_semantics=("parallel",)),
        cost_estimate=cost,
    )(x2d, w_kn, b_2d)

    return out2d.reshape(-1, out_len, output_size)


def postnet_apply(inputs, w_kn, b_2d, out_len, output_size, compute_dtype=None,
                  out_dtype=None, min_pallas_rows=_TM_MAX):
    """Convenience wrapper: for M below ~one tile, the fused XLA dot beats the
    pallas_call launch + single-step overhead, so gate on M (~TM_MAX rows)."""
    M = 1
    for d in inputs.shape[:-1]:
        M *= d
    if M < min_pallas_rows:
        if out_dtype is None:
            out_dtype = compute_dtype if compute_dtype is not None else inputs.dtype
        x = inputs.reshape(-1, inputs.shape[-1])
        if compute_dtype is not None:
            x = x.astype(compute_dtype)
            w_kn = w_kn.astype(compute_dtype)
        y = (jnp.dot(x, w_kn, preferred_element_type=jnp.float32)
             + b_2d).astype(out_dtype)
        return y.reshape(-1, out_len, output_size)
    return postnet_forward(inputs, w_kn, b_2d, out_len, output_size,
                           compute_dtype=compute_dtype, out_dtype=out_dtype)


if __name__ == "__main__":
    # Small, module-consistent shapes.
    batch, seq = 2, 8
    input_size = 32
    out_len = 4
    output_size = 80                      # PyTorch default
    out_features = out_len * output_size  # 320

    key = jax.random.PRNGKey(0)
    kx, kw, kb, kx2 = jax.random.split(key, 4)

    # Deterministic synthetic parameters (mimic nn.Linear init: U(-1/sqrt(K), 1/sqrt(K))).
    bound = 1.0 / (input_size ** 0.5)
    weight = jax.random.uniform(kw, (out_features, input_size), jnp.float32,
                                minval=-bound, maxval=bound)
    bias = jax.random.uniform(kb, (out_features,), jnp.float32,
                              minval=-bound, maxval=bound)
    inputs = jax.random.normal(kx, (batch, seq, input_size), jnp.float32)

    # One-time param prep (outside the hot path).
    w_kn, b_2d = prepare_postnet_params(weight, bias)

    # --- Check 1: tiny demo shape (single-tile Pallas path, exact f32). ------
    out = postnet_forward(inputs, w_kn, b_2d, out_len, output_size)
    out = jax.block_until_ready(out)
    ref = (inputs.reshape(-1, input_size) @ weight.T + bias).reshape(
        -1, out_len, output_size)
    assert out.shape == (batch * seq, out_len, output_size)
    assert jnp.allclose(out, ref, atol=1e-5, rtol=1e-5)

    # --- Check 2: M > TM_MAX exercises the tiled / pipelined path with two
    #              balanced 1280-row tiles (M = 4*640 = 2560). ----------------
    inputs_big = jax.random.normal(kx2, (4, 640, input_size), jnp.float32)
    out_big = postnet_forward(inputs_big, w_kn, b_2d, out_len, output_size)
    out_big = jax.block_until_ready(out_big)
    ref_big = (inputs_big.reshape(-1, input_size) @ weight.T + bias).reshape(
        -1, out_len, output_size)
    assert out_big.shape == (4 * 640, out_len, output_size)
    assert jnp.allclose(out_big, ref_big, atol=1e-5, rtol=1e-5)

    # --- Check 3: bf16 I/O fast path (opt-in; looser tolerance vs f32 ref). --
    out_bf16 = postnet_forward(inputs_big, w_kn, b_2d, out_len, output_size,
                               compute_dtype=jnp.bfloat16,
                               out_dtype=jnp.bfloat16)
    out_bf16 = jax.block_until_ready(out_bf16)
    assert out_bf16.dtype == jnp.bfloat16
    assert jnp.allclose(out_bf16.astype(jnp.float32), ref_big,
                        atol=5e-2, rtol=5e-2)

    print("KERNEL_OK")
</pallas_src>

<mosaic_0001>
module attributes {stable_mosaic.version = 11 : i64} {
  func.func @_postnet_kernel(%arg0: i32, %arg1: memref<16x32xf32, #tpu.memory_space<vmem>>, %arg2: memref<32x320xf32, #tpu.memory_space<vmem>>, %arg3: memref<1x320xf32, #tpu.memory_space<vmem>>, %arg4: memref<16x320xf32, #tpu.memory_space<vmem>>) attributes {dimension_semantics = [#tpu.dimension_semantics<parallel>], iteration_bounds = array<i64: 1>, scalar_prefetch = 0 : i64, scratch_operands = 0 : i64, tpu.core_type = #tpu.core_type<tc>, window_params = [{transform_indices = @transform_0, window_bounds = array<i64: 16, 32>}, {pipeline_mode = #tpu.pipeline_mode<synchronous>, transform_indices = @transform_1, window_bounds = array<i64: 32, 320>}, {pipeline_mode = #tpu.pipeline_mode<synchronous>, transform_indices = @transform_2, window_bounds = array<i64: 1, 320>}, {transform_indices = @transform_3, window_bounds = array<i64: 16, 320>}]} {
    %c0 = arith.constant 0 : index
    %c0_0 = arith.constant 0 : index
    %0 = vector.load %arg1[%c0, %c0_0] : memref<16x32xf32, #tpu.memory_space<vmem>>, vector<16x32xf32>
    %c0_1 = arith.constant 0 : index
    %c0_2 = arith.constant 0 : index
    %1 = vector.load %arg2[%c0_1, %c0_2] : memref<32x320xf32, #tpu.memory_space<vmem>>, vector<32x320xf32>
    %cst = arith.constant dense<0.000000e+00> : vector<16x320xf32>
    %2 = tpu.matmul %0, %1, %cst {dimension_numbers = #tpu.dot_dimension_numbers<[1], [0], [0], [1], [0, 0, 1, 1], [], []>} : vector<16x32xf32>, vector<32x320xf32>, vector<16x320xf32> -> vector<16x320xf32>
    %c0_3 = arith.constant 0 : index
    %c0_4 = arith.constant 0 : index
    %3 = vector.load %arg3[%c0_3, %c0_4] : memref<1x320xf32, #tpu.memory_space<vmem>>, vector<1x320xf32>
    %4 = vector.broadcast %3 : vector<1x320xf32> to vector<16x320xf32>
    %5 = arith.addf %2, %4 : vector<16x320xf32>
    %c0_5 = arith.constant 0 : index
    %c0_6 = arith.constant 0 : index
    %6 = vector.load %arg4[%c0_5, %c0_6] : memref<16x320xf32, #tpu.memory_space<vmem>>, vector<16x320xf32>
    tpu.vector_store %arg4[%c0_5, %c0_6], %5 {strides = array<i32>} : memref<16x320xf32, #tpu.memory_space<vmem>>, vector<16x320xf32>,
    return
  }
  func.func @transform_0(%arg0: i32) -> (i32, i32) {
    %c0_i32 = arith.constant 0 : i32
    %c0_i32_0 = arith.constant 0 : i32
    return %arg0, %c0_i32 : i32, i32
  }
  func.func @transform_1(%arg0: i32) -> (i32, i32) {
    %c0_i32 = arith.constant 0 : i32
    %c0_i32_0 = arith.constant 0 : i32
    %c0_i32_1 = arith.constant 0 : i32
    return %c0_i32, %c0_i32_0 : i32, i32
  }
  func.func @transform_2(%arg0: i32) -> (i32, i32) {
    %c0_i32 = arith.constant 0 : i32
    %c0_i32_0 = arith.constant 0 : i32
    %c0_i32_1 = arith.constant 0 : i32
    return %c0_i32, %c0_i32_0 : i32, i32
  }
  func.func @transform_3(%arg0: i32) -> (i32, i32) {
    %c0_i32 = arith.constant 0 : i32
    %c0_i32_0 = arith.constant 0 : i32
    return %arg0, %c0_i32 : i32, i32
  }
}

</mosaic_0001>

<bundles_post_ra>
// kernel: postnet_forward.1
= control target key start
LH: loop header
LB: loop body
LE: loop exit
PB: predicated region body
PF: predicated region fallthrough
CT: control target
= control target key end

     0   :  { %8 = vsyncpa [#allocation3], 0  ;;  %s371_s0 = inlined_call_operand.hbm [shape: f32[16,32], index: 0, kind: input, shape index: {}]   ;;  %s372_s1 = inlined_call_operand.hbm [shape: f32[32,320], index: 1, kind: input, shape index: {}]   ;;  %s373_s2 = inlined_call_operand.vmem [shape: f32[1,320], index: 2, kind: input, shape index: {}]   ;;  %s374_s3 = inlined_call_operand.vmem [shape: f32[16,320], index: 3, kind: output, shape index: {}]  }
   0x1   :  { %9 = vsyncpa [#allocation5], 0  ;;  %s317_s12 = smov [#allocation2]  }
   0x2   :  { %s15_s13 = sshll.u32 %s317_s12, 4  ;;  %s16_s13 = int_to_ptr.vmem [resolvable:$true] %s15_s13 }
   0x3   :  { %s281_s14 = scalar_lea.vmem %s16_s13, 256  ;;  %p286_p1 = scmp.lt.s32.totalorder %s16_s13, %s16_s13 }
   0x4   :  { %p282_p0 = scmp.ne.s32.totalorder %s16_s13, %s281_s14  ;;  %p287_p2 = scmp.lt.s32.totalorder %s281_s14, %s281_s14 }
   0x6   :  { %p288_p3 = por %p287_p2, %p286_p1 }
   0x8   :  { %p289_p4 = pnand %p288_p3, %p282_p0 }
   0xa   :  { %292 = shalt.err (!%p289_p4)
}
   0xb   :  { %s318_s15 = smov 128   ;;  %s319_s16 = smov 8  }
   0xc   :  { %21 = dma.hbm_to_vmem [thread:$0]  %s371_s0, 256, %s16_s13, [#allocation3], %s318_s15, %s318_s15, %s319_s16  }
   0xd   :  { %s320_s19 = smov [#allocation4]  }
   0xe   :  { %s27_s20 = sshll.u32 %s320_s19, 4  ;;  %s28_s20 = int_to_ptr.vmem [resolvable:$true] %s27_s20 }
   0xf   :  { %s301_s21 = scalar_lea.vmem %s28_s20, 1536  ;;  %p306_p6 = scmp.lt.s32.totalorder %s28_s20, %s28_s20 }
  0x10   :  { %p302_p5 = scmp.ne.s32.totalorder %s28_s20, %s301_s21  ;;  %p307_p7 = scmp.lt.s32.totalorder %s301_s21, %s301_s21 }
  0x12   :  { %p308_p8 = por %p307_p7, %p306_p6 }
  0x14   :  { %p309_p9 = pnand %p308_p8, %p302_p5 }
  0x16   :  { %312 = shalt.err (!%p309_p9)
}
  0x17   :  { %s321_s22 = smov 384   ;;  %s322_s23 = smov 24  }
  0x18   :  { %33 = dma.hbm_to_vmem [thread:$0]  %s372_s1, 1536, %s28_s20, [#allocation5], %s321_s22, %s321_s22, %s322_s23  }
  0x19   :  { %313 = dma.done.wait [#allocation3], 256  }
  0x1a   :  { %314 = vsyncadd [#allocation3], 4294967040 }
  0x1b   :  { %315 = dma.done.wait [#allocation5], 1536  }
  0x1c   :  { %316 = vsyncadd [#allocation5], 4294965760  ;;  %v323_v0 = vmov 0.0   ;;  %v54_v1 = vld [vmem:[#allocation4 + $0x50] sm:$0xff]  ;;  %v53_v2 = vld [vmem:[#allocation4 + $0x48] sm:$0xff]  ;;  %vm73_vm0 = vcmask 261120   ;;  %v58_v15 = vlaneseq }
  0x1d   :  { %144 = vmatprep.mubr.f32.mxu0 %v323_v0  ;;  %v51_v3 = vld [vmem:[#allocation4 + $0x38] sm:$0xff]  ;;  %104 = vmatprep.subr.mxu0 %v54_v1  ;;  %v50_v5 = vld [vmem:[#allocation4 + $0x30] sm:$0xff]  ;;  %v48_v6 = vld [vmem:[#allocation4 + $0x20] sm:$0xff]  ;;  %vm234_vm1 = vcmask 523264  }
  0x1e   :  { %v55_v4 = vld [vmem:[#allocation4 + $0x58] sm:$0xff]  ;;  %105 = vmatpush1.msra.mxu0 %v53_v2  ;;  %v52_v7 = vld [vmem:[#allocation4 + $0x40] sm:$0xff]  ;;  %v49_v9 = vld [vmem:[#allocation4 + $0x28] sm:$0xff]  ;;  %v59_v16 = vshrl.u32 %v58_v15, 7 }
  0x1f   :  { %255 = vmatprep.subr.mxu1 %v55_v4  ;;  %106 = vmatprep.subr.mxu0 %v51_v3  ;;  %v47_v8 = vld [vmem:[#allocation4 + $0x18] sm:$0xff]  ;;  %v45_v10 = vld [vmem:[#allocation4 + $0x8] sm:$0xff]  ;;  %v44_v11 = vld [vmem:[#allocation4] sm:$0xff] }
  0x20   :  { %256 = vmatpush3.msra.mxu1 %v55_v4  ;;  %107 = vmatpush1.msra.mxu0 %v50_v5  ;;  %v46_v12 = vld [vmem:[#allocation4 + $0x10] sm:$0xff]  ;;  %v43_v14 = vld [vmem:[#allocation2 + $0x8] sm:$0xff]  ;;  %v60_v17 = vsub.s32 0, %v59_v16  ;;  %v64_v19 = vsub.s32 1, %v59_v16  ;;  %v68_v20 = vsub.s32 2, %v59_v16 }
  0x21   :  { %257 = vmatprep.subr.mxu1 %v52_v7  ;;  %108 = vmatprep.subr.mxu0 %v48_v6  ;;  %v42_v13 = vld [vmem:[#allocation2] sm:$0xff] }
  0x22   :  { %258 = vmatpush3.msra.mxu1 %v52_v7  ;;  %109 = vmatpush1.msra.mxu0 %v47_v8  ;;  %v56_v18 = vld [vmem:[%s373_s2] sm:$0x7] }
  0x23   :  { %259 = vmatprep.subr.mxu1 %v49_v9  ;;  %110 = vmatprep.subr.mxu0 %v45_v10  ;;  %v61_v21 = vrot.slane %v56_v18, %v60_v17  ;;  %v65_v22 = vrot.slane %v56_v18, %v64_v19  ;;  %v69_v23 = vrot.slane %v56_v18, %v68_v20 }
  0x24   :  { %260 = vmatpush3.msra.mxu1 %v49_v9  ;;  %111 = vmatpush1.msra.mxu0 %v44_v11 }
  0x25   :  { %261 = vmatprep.subr.mxu1 %v46_v12  ;;  %245 = vmatmul.mubr.msk.f32.vlgmr.msra.gmra.mxu0 %vm73_vm0, %v42_v13 }
  0x26   :  { %262 = vmatpush3.msra.mxu1 %v46_v12  ;;  %263 = vmatprep.mubr.msk.f32.mxu1 %vm73_vm0, %v42_v13 }
  0x27   :  { %150 = vmatprep.mubr.f32.mxu0 %v323_v0  ;;  %264 = vmatmul.mubr.msk.f32.vlgmr.msra.gmra.mxu1 %vm73_vm0, %v43_v14 }
  0x29   :  { %246 = vmatmul.mubr.msk.f32.gmra.mxu0 %vm73_vm0, %v43_v14 }
  0xe5   :  { %v146_v24 = vpop.f32.mrf.mxu0 }
  0xe6   :  { %v147_v25 = vadd.f32 %v146_v24, %v61_v21 }
  0xe7   :  { %v148_v26 = vpop.f32.mrf.mxu0  ;;  %v265_v27 = vpop.f32.mrf.mxu1 }
  0xe8   :  { %232 = vst [vmem:[%s374_s3] sm:$0xff] %v147_v25  ;;  %v149_v28 = vadd.f32 %v148_v26, %v65_v22  ;;  %v229_v29 = vadd.f32 %v265_v27, %v69_v23 }
  0xe9   :  { %v152_v30 = vpop.f32.mrf.mxu0  ;;  %v223_v31 = vpop.f32.mrf.mxu1 }
  0xea   :  { %233 = vst [vmem:[%s374_s3 + $0x8] sm:$0xff] %v149_v28  ;;  %238 = vst.msk [vmem:[%s374_s3 + $0x28] sm:$0xff] %vm234_vm1, %v229_v29  ;;  %v153_v32 = vadd.f32 %v152_v30, %v61_v21  ;;  %v224_v33 = vadd.f32 %v223_v31, %v69_v23 }
  0xeb   :  { %v154_v34 = vpop.f32.mrf.mxu0 }
  0xec   :  { %236 = vst [vmem:[%s374_s3 + $0x18] sm:$0xff] %v153_v32  ;;  %235 = vst.msk [vmem:[%s374_s3 + $0x10] sm:$0xff] %vm234_vm1, %v224_v33  ;;  %v155_v35 = vadd.f32 %v154_v34, %v65_v22 }
  0xee   :  { %237 = vst [vmem:[%s374_s3 + $0x20] sm:$0xff] %v155_v35 }
  0xef   :  { %243 = vsyncpa [#allocation3], 1 }
  0xf0   :  { %244 = vsyncpa [#allocation5], 1 }

</bundles_post_ra>
